<compile_context>
chip_gen: v7x
topology: tpu7x:2x2x1
jax: 0.10.0
libtpu: 0.0.40
codegen_flags: <defaults>
</compile_context>

<pallas_src>
import jax
import jax.numpy as jnp
from jax import lax
from jax.experimental import pallas as pl
from jax.experimental.pallas import tpu as pltpu

_LANE = 128            # lane width (hardware vreg)
_MAX_SUBLANES = 1024   # max sublane rows per block (double-buffered in+out ~15 MiB @ f32)
_MIN_PALLAS_N = 512    # below this, fixed launch/relayout costs dominate -> pure XLA path


def _round_up(x, m):
    return ((x + m - 1) // m) * m


def _gram_schmidt_kernel(x_ref, o_ref):
    # x_ref: (6, S, 128), o_ref: (9, S, 128); S is a multiple of the sublane packing.
    # Interleaved input layout (row-major flatten of (3, 2)): flat[2*i + j] = M[i, j].
    f32 = jnp.float32
    x0 = x_ref[0].astype(f32)
    y0 = x_ref[1].astype(f32)
    x1 = x_ref[2].astype(f32)
    y1 = x_ref[3].astype(f32)
    x2 = x_ref[4].astype(f32)
    y2 = x_ref[5].astype(f32)

    # normalize x (rsqrt -> EUP slot, free alongside the VALU work)
    inv_xn = lax.rsqrt(x0 * x0 + x1 * x1 + x2 * x2)
    x0 = x0 * inv_xn
    x1 = x1 * inv_xn
    x2 = x2 * inv_xn

    # project x out of y, then normalize
    d = x0 * y0 + x1 * y1 + x2 * y2
    y0 = y0 - d * x0
    y1 = y1 - d * x1
    y2 = y2 - d * x2
    inv_yn = lax.rsqrt(y0 * y0 + y1 * y1 + y2 * y2)
    y0 = y0 * inv_yn
    y1 = y1 * inv_yn
    y2 = y2 * inv_yn

    # z = x cross y
    z0 = x1 * y2 - x2 * y1
    z1 = x2 * y0 - x0 * y2
    z2 = x0 * y1 - x1 * y0

    dt = o_ref.dtype
    # R = [x | y | z] as columns; emit row-major flatten [R00, R01, R02, R10, ...]
    o_ref[0] = x0.astype(dt)
    o_ref[1] = y0.astype(dt)
    o_ref[2] = z0.astype(dt)
    o_ref[3] = x1.astype(dt)
    o_ref[4] = y1.astype(dt)
    o_ref[5] = z1.astype(dt)
    o_ref[6] = x2.astype(dt)
    o_ref[7] = y2.astype(dt)
    o_ref[8] = z2.astype(dt)


def _special_gramschmidt_ref(m):
    """Pure-JAX roma.special_gramschmidt on (..., 3, 2). Used only as test reference."""
    x = m[..., 0]
    y = m[..., 1]
    x = x / jnp.linalg.norm(x, axis=-1, keepdims=True)
    y = y - jnp.sum(x * y, axis=-1, keepdims=True) * x
    y = y / jnp.linalg.norm(y, axis=-1, keepdims=True)
    z = jnp.cross(x, y)
    return jnp.stack([x, y, z], axis=-1)


def _special_gramschmidt_fallback(flat6):
    """Small-batch path: same f32 + rsqrt math as the kernel (batch-size-independent numerics)."""
    m = flat6.reshape(-1, 3, 2).astype(jnp.float32)
    x = m[..., 0]
    y = m[..., 1]
    x = x * lax.rsqrt(jnp.sum(x * x, axis=-1, keepdims=True))
    y = y - jnp.sum(x * y, axis=-1, keepdims=True) * x
    y = y * lax.rsqrt(jnp.sum(y * y, axis=-1, keepdims=True))
    z = jnp.cross(x, y)
    return jnp.stack([x, y, z], axis=-1).astype(flat6.dtype)


def _special_gramschmidt_pallas(flat6):
    """flat6: (N, 6) interleaved (row-major flatten of (3, 2)) -> (N, 3, 3)."""
    n = flat6.shape[0]
    if n < _MIN_PALLAS_N:
        # small-batch fallback: kernel launch / pad / relayout fixed costs dominate
        return _special_gramschmidt_fallback(flat6)

    itemsize = jnp.dtype(flat6.dtype).itemsize
    sub_mult = max(8, 32 // itemsize)         # sublane packing: 8 (f32), 16 (bf16), 32 (8-bit)

    # pad only to the minimum dense-tile granularity (sub_mult * 128 rotations),
    # never to a full block multiple: at most ~1K dummy rotations.
    n_pad = _round_up(n, sub_mult * _LANE)
    r = n_pad // _LANE                        # sublane rows, multiple of sub_mult

    x = flat6
    if n_pad != n:
        # pad with a valid frame so padded rows never normalize a zero vector
        pad_row = jnp.array([1.0, 0.0, 0.0, 1.0, 0.0, 0.0], dtype=flat6.dtype)
        x = jnp.concatenate(
            [x, jnp.broadcast_to(pad_row, (n_pad - n, 6))], axis=0)

    # Block sizing: at least 2 (even) grid steps so v7x's two TensorCores both get work
    # (no-op on v5e/v6e), capped at _MAX_SUBLANES rows to amortize the ~0.35us/step overhead
    # while keeping the double-buffered working set small.
    num_blocks = max(2, -(-r // _MAX_SUBLANES))
    num_blocks += num_blocks % 2              # even split across the two cores
    s_block = _round_up(-(-r // num_blocks), sub_mult)
    s_block = max(sub_mult, min(s_block, r))
    grid = -(-r // s_block)                   # last block may be partial; Pallas clips it

    block_bytes = (6 + 9) * s_block * _LANE * itemsize
    vmem_limit = min(2 * block_bytes + (8 << 20), 64 << 20)   # dbl-buffered in+out + headroom

    # lane+sublane dense layout: (6, r, 128); batch -> (sublane row, lane).
    xt = x.T.reshape(6, r, _LANE)

    out = pl.pallas_call(
        _gram_schmidt_kernel,
        out_shape=jax.ShapeDtypeStruct((9, r, _LANE), flat6.dtype),
        grid_spec=pltpu.PrefetchScalarGridSpec(
            num_scalar_prefetch=0,
            grid=(grid,),
            in_specs=[pl.BlockSpec((6, s_block, _LANE), lambda i: (0, i, 0))],
            out_specs=pl.BlockSpec((9, s_block, _LANE), lambda i: (0, i, 0)),
        ),
        compiler_params=pltpu.CompilerParams(
            dimension_semantics=("parallel",),
            vmem_limit_bytes=vmem_limit,
        ),
    )(xt)

    out = out.reshape(9, n_pad)[:, :n].T      # (N, 9) row-major rotation matrices
    return out.reshape(n, 3, 3)


def gram_schmidt(sixd):
    """Mirrors moai GramSchmidt.forward reshape logic; hot path in Pallas."""
    out_shape = list(sixd.shape)
    out_shape[-1] = 3
    in_dims = sixd.ndim
    view = [-1, 3, 2]
    if in_dims == 2:
        if sixd.shape[-1] != 6:
            out_shape.insert(1, -1)
        out_shape.append(3)
    else:
        view.insert(1, sixd.shape[-3])
    m = sixd.reshape(view)                    # (..., 3, 2)
    flat = m.reshape(-1, 6)                   # interleaved per rotation
    rot = _special_gramschmidt_pallas(flat)   # (N, 3, 3)
    rot = rot.reshape(m.shape[:-2] + (3, 3))
    return rot.reshape(out_shape)


def _ref_forward(sixd):
    """Pure-JAX replica of the PyTorch module's forward (reference for testing)."""
    out_shape = list(sixd.shape)
    out_shape[-1] = 3
    in_dims = sixd.ndim
    view = [-1, 3, 2]
    if in_dims == 2:
        if sixd.shape[-1] != 6:
            out_shape.insert(1, -1)
        out_shape.append(3)
    else:
        view.insert(1, sixd.shape[-3])
    return _special_gramschmidt_ref(sixd.reshape(view)).reshape(out_shape)


if __name__ == "__main__":
    key = jax.random.PRNGKey(0)
    k1, k2, k3, k4 = jax.random.split(key, 4)

    gs = jax.jit(gram_schmidt)

    # (a) batch of 6D vectors -> Pallas kernel path, no padding needed (1024 % 1024 == 0)
    a = jax.random.normal(k1, (1024, 6), dtype=jnp.float32)
    out_a = jax.block_until_ready(gs(a))
    ref_a = _ref_forward(a)
    assert out_a.shape == (1024, 3, 3), out_a.shape
    assert jnp.allclose(out_a, ref_a, atol=1e-5, rtol=1e-5), float(
        jnp.max(jnp.abs(out_a - ref_a)))

    # (b) 3D (B, 3, 2) input -> module's 3D reshape branch (small-batch fallback path)
    b = jax.random.normal(k2, (8, 3, 2), dtype=jnp.float32)
    out_b = jax.block_until_ready(gs(b))
    ref_b = _ref_forward(b)
    assert out_b.shape == (8, 3, 3), out_b.shape
    assert jnp.allclose(out_b, ref_b, atol=1e-5, rtol=1e-5), float(
        jnp.max(jnp.abs(out_b - ref_b)))

    # (c) 2D input with last dim != 6 (multiple rotations per row, fallback path)
    c = jax.random.normal(k3, (4, 12), dtype=jnp.float32)
    out_c = jax.block_until_ready(gs(c))
    ref_c = _ref_forward(c)
    assert out_c.shape == (4, 2, 3, 3), out_c.shape
    assert jnp.allclose(out_c, ref_c, atol=1e-5, rtol=1e-5), float(
        jnp.max(jnp.abs(out_c - ref_c)))

    # (d) ragged batch -> exercises minimal padding (2560 -> 3072), a 2-step grid and a
    #     clipped partial last block on the Pallas path
    d = jax.random.normal(k4, (2560, 6), dtype=jnp.float32)
    out_d = jax.block_until_ready(gs(d))
    ref_d = _ref_forward(d)
    assert out_d.shape == (2560, 3, 3), out_d.shape
    assert jnp.allclose(out_d, ref_d, atol=1e-5, rtol=1e-5), float(
        jnp.max(jnp.abs(out_d - ref_d)))

    print("KERNEL_OK")
</pallas_src>

<mosaic_0001>
module attributes {stable_mosaic.version = 11 : i64} {
  func.func @_gram_schmidt_kernel(%arg0: i32, %arg1: memref<6x8x128xf32, #tpu.memory_space<vmem>>, %arg2: memref<9x8x128xf32, #tpu.memory_space<vmem>>) attributes {dimension_semantics = [#tpu.dimension_semantics<parallel>], iteration_bounds = array<i64: 1>, scalar_prefetch = 0 : i64, scratch_operands = 0 : i64, tpu.core_type = #tpu.core_type<tc>, window_params = [{transform_indices = @transform_0, window_bounds = array<i64: 6, 8, 128>}, {transform_indices = @transform_1, window_bounds = array<i64: 9, 8, 128>}]} {
    %c0 = arith.constant 0 : index
    %c0_0 = arith.constant 0 : index
    %c0_1 = arith.constant 0 : index
    %0 = vector.load %arg1[%c0, %c0_0, %c0_1] : memref<6x8x128xf32, #tpu.memory_space<vmem>>, vector<1x8x128xf32>
    %1 = vector.shape_cast %0 : vector<1x8x128xf32> to vector<8x128xf32>
    %c1 = arith.constant 1 : index
    %c0_2 = arith.constant 0 : index
    %c0_3 = arith.constant 0 : index
    %2 = vector.load %arg1[%c1, %c0_2, %c0_3] : memref<6x8x128xf32, #tpu.memory_space<vmem>>, vector<1x8x128xf32>
    %3 = vector.shape_cast %2 : vector<1x8x128xf32> to vector<8x128xf32>
    %c2 = arith.constant 2 : index
    %c0_4 = arith.constant 0 : index
    %c0_5 = arith.constant 0 : index
    %4 = vector.load %arg1[%c2, %c0_4, %c0_5] : memref<6x8x128xf32, #tpu.memory_space<vmem>>, vector<1x8x128xf32>
    %5 = vector.shape_cast %4 : vector<1x8x128xf32> to vector<8x128xf32>
    %c3 = arith.constant 3 : index
    %c0_6 = arith.constant 0 : index
    %c0_7 = arith.constant 0 : index
    %6 = vector.load %arg1[%c3, %c0_6, %c0_7] : memref<6x8x128xf32, #tpu.memory_space<vmem>>, vector<1x8x128xf32>
    %7 = vector.shape_cast %6 : vector<1x8x128xf32> to vector<8x128xf32>
    %c4 = arith.constant 4 : index
    %c0_8 = arith.constant 0 : index
    %c0_9 = arith.constant 0 : index
    %8 = vector.load %arg1[%c4, %c0_8, %c0_9] : memref<6x8x128xf32, #tpu.memory_space<vmem>>, vector<1x8x128xf32>
    %9 = vector.shape_cast %8 : vector<1x8x128xf32> to vector<8x128xf32>
    %c5 = arith.constant 5 : index
    %c0_10 = arith.constant 0 : index
    %c0_11 = arith.constant 0 : index
    %10 = vector.load %arg1[%c5, %c0_10, %c0_11] : memref<6x8x128xf32, #tpu.memory_space<vmem>>, vector<1x8x128xf32>
    %11 = vector.shape_cast %10 : vector<1x8x128xf32> to vector<8x128xf32>
    %12 = arith.mulf %1, %1 : vector<8x128xf32>
    %13 = arith.mulf %5, %5 : vector<8x128xf32>
    %14 = arith.addf %12, %13 : vector<8x128xf32>
    %15 = arith.mulf %9, %9 : vector<8x128xf32>
    %16 = arith.addf %14, %15 : vector<8x128xf32>
    %17 = math.rsqrt %16 : vector<8x128xf32>
    %18 = arith.mulf %1, %17 : vector<8x128xf32>
    %19 = arith.mulf %5, %17 : vector<8x128xf32>
    %20 = arith.mulf %9, %17 : vector<8x128xf32>
    %21 = arith.mulf %18, %3 : vector<8x128xf32>
    %22 = arith.mulf %19, %7 : vector<8x128xf32>
    %23 = arith.addf %21, %22 : vector<8x128xf32>
    %24 = arith.mulf %20, %11 : vector<8x128xf32>
    %25 = arith.addf %23, %24 : vector<8x128xf32>
    %26 = arith.mulf %25, %18 : vector<8x128xf32>
    %27 = arith.subf %3, %26 : vector<8x128xf32>
    %28 = arith.mulf %25, %19 : vector<8x128xf32>
    %29 = arith.subf %7, %28 : vector<8x128xf32>
    %30 = arith.mulf %25, %20 : vector<8x128xf32>
    %31 = arith.subf %11, %30 : vector<8x128xf32>
    %32 = arith.mulf %27, %27 : vector<8x128xf32>
    %33 = arith.mulf %29, %29 : vector<8x128xf32>
    %34 = arith.addf %32, %33 : vector<8x128xf32>
    %35 = arith.mulf %31, %31 : vector<8x128xf32>
    %36 = arith.addf %34, %35 : vector<8x128xf32>
    %37 = math.rsqrt %36 : vector<8x128xf32>
    %38 = arith.mulf %27, %37 : vector<8x128xf32>
    %39 = arith.mulf %29, %37 : vector<8x128xf32>
    %40 = arith.mulf %31, %37 : vector<8x128xf32>
    %41 = arith.mulf %19, %40 : vector<8x128xf32>
    %42 = arith.mulf %20, %39 : vector<8x128xf32>
    %43 = arith.subf %41, %42 : vector<8x128xf32>
    %44 = arith.mulf %20, %38 : vector<8x128xf32>
    %45 = arith.mulf %18, %40 : vector<8x128xf32>
    %46 = arith.subf %44, %45 : vector<8x128xf32>
    %47 = arith.mulf %18, %39 : vector<8x128xf32>
    %48 = arith.mulf %19, %38 : vector<8x128xf32>
    %49 = arith.subf %47, %48 : vector<8x128xf32>
    %c0_12 = arith.constant 0 : index
    %c0_13 = arith.constant 0 : index
    %c0_14 = arith.constant 0 : index
    %50 = vector.load %arg2[%c0_12, %c0_13, %c0_14] : memref<9x8x128xf32, #tpu.memory_space<vmem>>, vector<1x8x128xf32>
    %51 = vector.shape_cast %50 : vector<1x8x128xf32> to vector<8x128xf32>
    %52 = vector.shape_cast %18 : vector<8x128xf32> to vector<1x8x128xf32>
    tpu.vector_store %arg2[%c0_12, %c0_13, %c0_14], %52 {strides = array<i32>} : memref<9x8x128xf32, #tpu.memory_space<vmem>>, vector<1x8x128xf32>,
    %c1_15 = arith.constant 1 : index
    %c0_16 = arith.constant 0 : index
    %c0_17 = arith.constant 0 : index
    %53 = vector.load %arg2[%c1_15, %c0_16, %c0_17] : memref<9x8x128xf32, #tpu.memory_space<vmem>>, vector<1x8x128xf32>
    %54 = vector.shape_cast %53 : vector<1x8x128xf32> to vector<8x128xf32>
    %55 = vector.shape_cast %38 : vector<8x128xf32> to vector<1x8x128xf32>
    tpu.vector_store %arg2[%c1_15, %c0_16, %c0_17], %55 {strides = array<i32>} : memref<9x8x128xf32, #tpu.memory_space<vmem>>, vector<1x8x128xf32>,
    %c2_18 = arith.constant 2 : index
    %c0_19 = arith.constant 0 : index
    %c0_20 = arith.constant 0 : index
    %56 = vector.load %arg2[%c2_18, %c0_19, %c0_20] : memref<9x8x128xf32, #tpu.memory_space<vmem>>, vector<1x8x128xf32>
    %57 = vector.shape_cast %56 : vector<1x8x128xf32> to vector<8x128xf32>
    %58 = vector.shape_cast %43 : vector<8x128xf32> to vector<1x8x128xf32>
    tpu.vector_store %arg2[%c2_18, %c0_19, %c0_20], %58 {strides = array<i32>} : memref<9x8x128xf32, #tpu.memory_space<vmem>>, vector<1x8x128xf32>,
    %c3_21 = arith.constant 3 : index
    %c0_22 = arith.constant 0 : index
    %c0_23 = arith.constant 0 : index
    %59 = vector.load %arg2[%c3_21, %c0_22, %c0_23] : memref<9x8x128xf32, #tpu.memory_space<vmem>>, vector<1x8x128xf32>
    %60 = vector.shape_cast %59 : vector<1x8x128xf32> to vector<8x128xf32>
    %61 = vector.shape_cast %19 : vector<8x128xf32> to vector<1x8x128xf32>
    tpu.vector_store %arg2[%c3_21, %c0_22, %c0_23], %61 {strides = array<i32>} : memref<9x8x128xf32, #tpu.memory_space<vmem>>, vector<1x8x128xf32>,
    %c4_24 = arith.constant 4 : index
    %c0_25 = arith.constant 0 : index
    %c0_26 = arith.constant 0 : index
    %62 = vector.load %arg2[%c4_24, %c0_25, %c0_26] : memref<9x8x128xf32, #tpu.memory_space<vmem>>, vector<1x8x128xf32>
    %63 = vector.shape_cast %62 : vector<1x8x128xf32> to vector<8x128xf32>
    %64 = vector.shape_cast %39 : vector<8x128xf32> to vector<1x8x128xf32>
    tpu.vector_store %arg2[%c4_24, %c0_25, %c0_26], %64 {strides = array<i32>} : memref<9x8x128xf32, #tpu.memory_space<vmem>>, vector<1x8x128xf32>,
    %c5_27 = arith.constant 5 : index
    %c0_28 = arith.constant 0 : index
    %c0_29 = arith.constant 0 : index
    %65 = vector.load %arg2[%c5_27, %c0_28, %c0_29] : memref<9x8x128xf32, #tpu.memory_space<vmem>>, vector<1x8x128xf32>
    %66 = vector.shape_cast %65 : vector<1x8x128xf32> to vector<8x128xf32>
    %67 = vector.shape_cast %46 : vector<8x128xf32> to vector<1x8x128xf32>
    tpu.vector_store %arg2[%c5_27, %c0_28, %c0_29], %67 {strides = array<i32>} : memref<9x8x128xf32, #tpu.memory_space<vmem>>, vector<1x8x128xf32>,
    %c6 = arith.constant 6 : index
    %c0_30 = arith.constant 0 : index
    %c0_31 = arith.constant 0 : index
    %68 = vector.load %arg2[%c6, %c0_30, %c0_31] : memref<9x8x128xf32, #tpu.memory_space<vmem>>, vector<1x8x128xf32>
    %69 = vector.shape_cast %68 : vector<1x8x128xf32> to vector<8x128xf32>
    %70 = vector.shape_cast %20 : vector<8x128xf32> to vector<1x8x128xf32>
    tpu.vector_store %arg2[%c6, %c0_30, %c0_31], %70 {strides = array<i32>} : memref<9x8x128xf32, #tpu.memory_space<vmem>>, vector<1x8x128xf32>,
    %c7 = arith.constant 7 : index
    %c0_32 = arith.constant 0 : index
    %c0_33 = arith.constant 0 : index
    %71 = vector.load %arg2[%c7, %c0_32, %c0_33] : memref<9x8x128xf32, #tpu.memory_space<vmem>>, vector<1x8x128xf32>
    %72 = vector.shape_cast %71 : vector<1x8x128xf32> to vector<8x128xf32>
    %73 = vector.shape_cast %40 : vector<8x128xf32> to vector<1x8x128xf32>
    tpu.vector_store %arg2[%c7, %c0_32, %c0_33], %73 {strides = array<i32>} : memref<9x8x128xf32, #tpu.memory_space<vmem>>, vector<1x8x128xf32>,
    %c8 = arith.constant 8 : index
    %c0_34 = arith.constant 0 : index
    %c0_35 = arith.constant 0 : index
    %74 = vector.load %arg2[%c8, %c0_34, %c0_35] : memref<9x8x128xf32, #tpu.memory_space<vmem>>, vector<1x8x128xf32>
    %75 = vector.shape_cast %74 : vector<1x8x128xf32> to vector<8x128xf32>
    %76 = vector.shape_cast %49 : vector<8x128xf32> to vector<1x8x128xf32>
    tpu.vector_store %arg2[%c8, %c0_34, %c0_35], %76 {strides = array<i32>} : memref<9x8x128xf32, #tpu.memory_space<vmem>>, vector<1x8x128xf32>,
    return
  }
  func.func @transform_0(%arg0: i32) -> (i32, i32, i32) {
    %c0_i32 = arith.constant 0 : i32
    %c0_i32_0 = arith.constant 0 : i32
    %c0_i32_1 = arith.constant 0 : i32
    return %c0_i32, %arg0, %c0_i32_0 : i32, i32, i32
  }
  func.func @transform_1(%arg0: i32) -> (i32, i32, i32) {
    %c0_i32 = arith.constant 0 : i32
    %c0_i32_0 = arith.constant 0 : i32
    %c0_i32_1 = arith.constant 0 : i32
    return %c0_i32, %arg0, %c0_i32_0 : i32, i32, i32
  }
}

</mosaic_0001>

<bundles_post_ra>
// kernel: gram_schmidt.1
= control target key start
LH: loop header
LB: loop body
LE: loop exit
PB: predicated region body
PF: predicated region fallthrough
CT: control target
= control target key end

     0   :  { %s150_s0 = inlined_call_operand.vmem [shape: f32[6,8,128], index: 0, kind: input, shape index: {}]   ;;  %s151_s1 = inlined_call_operand.vmem [shape: f32[9,8,128], index: 1, kind: output, shape index: {}]  }
   0x1   :  { %v8_v0 = vld [vmem:[%s150_s0] sm:$0xff]  ;;  %v79_v1 = vld [vmem:[%s150_s0 + $0x10] sm:$0xff]  ;;  %v78_v9 = vld [vmem:[%s150_s0 + $0x8] sm:$0xff] }
   0x2   :  { %v81_v2 = vld [vmem:[%s150_s0 + $0x20] sm:$0xff]  ;;  %v19_v3 = vmul.f32 %v8_v0, %v8_v0  ;;  %v20_v4 = vmul.f32 %v79_v1, %v79_v1  ;;  %v80_v10 = vld [vmem:[%s150_s0 + $0x18] sm:$0xff]  ;;  %v82_v11 = vld [vmem:[%s150_s0 + $0x28] sm:$0xff] }
   0x3   :  { %v22_v5 = vmul.f32 %v81_v2, %v81_v2 }
   0x4   :  { %v21_v6 = vadd.f32 %v20_v4, %v19_v3 }
   0x6   :  { %v23_v7 = vadd.f32 %v22_v5, %v21_v6 }
   0x8   :  { %91 = vrsqrt.f32 %v23_v7 }
  0x12   :  { %v92_v8 = vpop.eup %91 }
  0x13   :  { %v25_v12 = vmul.f32 %v92_v8, %v8_v0  ;;  %v26_v13 = vmul.f32 %v92_v8, %v79_v1  ;;  %v27_v14 = vmul.f32 %v92_v8, %v81_v2 }
  0x15   :  { %57 = vst [vmem:[%s151_s1] sm:$0xff] %v25_v12  ;;  %85 = vst [vmem:[%s151_s1 + $0x18] sm:$0xff] %v26_v13  ;;  %v28_v15 = vmul.f32 %v78_v9, %v25_v12  ;;  %v29_v16 = vmul.f32 %v80_v10, %v26_v13  ;;  %v31_v17 = vmul.f32 %v82_v11, %v27_v14 }
  0x16   :  { %88 = vst [vmem:[%s151_s1 + $0x30] sm:$0xff] %v27_v14 }
  0x17   :  { %v30_v18 = vadd.f32 %v29_v16, %v28_v15 }
  0x19   :  { %v32_v19 = vadd.f32 %v31_v17, %v30_v18 }
  0x1b   :  { %v33_v20 = vmul.f32 %v32_v19, %v25_v12  ;;  %v35_v21 = vmul.f32 %v32_v19, %v26_v13  ;;  %v37_v22 = vmul.f32 %v32_v19, %v27_v14 }
  0x1d   :  { %v34_v23 = vsub.f32 %v78_v9, %v33_v20  ;;  %v36_v24 = vsub.f32 %v80_v10, %v35_v21  ;;  %v38_v25 = vsub.f32 %v82_v11, %v37_v22 }
  0x1f   :  { %v39_v26 = vmul.f32 %v34_v23, %v34_v23  ;;  %v40_v27 = vmul.f32 %v36_v24, %v36_v24  ;;  %v42_v28 = vmul.f32 %v38_v25, %v38_v25 }
  0x21   :  { %v41_v29 = vadd.f32 %v40_v27, %v39_v26 }
  0x23   :  { %v43_v30 = vadd.f32 %v42_v28, %v41_v29 }
  0x25   :  { %93 = vrsqrt.f32 %v43_v30 }
  0x2f   :  { %v94_v31 = vpop.eup %93 }
  0x30   :  { %v45_v32 = vmul.f32 %v94_v31, %v34_v23  ;;  %v46_v33 = vmul.f32 %v94_v31, %v36_v24  ;;  %v47_v34 = vmul.f32 %v94_v31, %v38_v25 }
  0x32   :  { %83 = vst [vmem:[%s151_s1 + $0x8] sm:$0xff] %v45_v32  ;;  %v48_v35 = vmul.f32 %v47_v34, %v26_v13  ;;  %v49_v36 = vmul.f32 %v46_v33, %v27_v14  ;;  %86 = vst [vmem:[%s151_s1 + $0x20] sm:$0xff] %v46_v33  ;;  %v51_v37 = vmul.f32 %v45_v32, %v27_v14 }
  0x33   :  { %89 = vst [vmem:[%s151_s1 + $0x38] sm:$0xff] %v47_v34  ;;  %v52_v38 = vmul.f32 %v47_v34, %v25_v12  ;;  %v54_v39 = vmul.f32 %v46_v33, %v25_v12  ;;  %v55_v40 = vmul.f32 %v45_v32, %v26_v13 }
  0x34   :  { %v50_v41 = vsub.f32 %v48_v35, %v49_v36 }
  0x35   :  { %v53_v42 = vsub.f32 %v51_v37, %v52_v38  ;;  %v56_v43 = vsub.f32 %v54_v39, %v55_v40 }
  0x36   :  { %84 = vst [vmem:[%s151_s1 + $0x10] sm:$0xff] %v50_v41 }
  0x37   :  { %87 = vst [vmem:[%s151_s1 + $0x28] sm:$0xff] %v53_v42  ;;  %90 = vst [vmem:[%s151_s1 + $0x40] sm:$0xff] %v56_v43 }

</bundles_post_ra>
